<compile_context>
chip_gen: v6e
topology: v6e:2x2x1
jax: 0.10.0
libtpu: 0.0.40
codegen_flags: <defaults>
</compile_context>

<pallas_src>
import functools

import jax
import jax.numpy as jnp
from jax.experimental import pallas as pl
from jax.experimental.pallas import tpu as pltpu


def _round_up(n, m):
    return ((n + m - 1) // m) * m


# ----------------------------------------------------------------------------
# kernel
# ----------------------------------------------------------------------------
def vae_kernel(x_ref, w1e_ref, b1e_ref, wmv_ref, bmv_ref, eps_ref,
               w1d_ref, b1d_ref, w2d_ref, b2d_ref,
               recon_ref, mu_ref, logvar_ref, *, e_pad):
    # ----- encoder fc1 (bf16 operands, f32 accumulate) -----
    x = x_ref[...].astype(jnp.bfloat16)                                  # (Bp, Dp)
    h1 = jnp.dot(x, w1e_ref[...],
                 preferred_element_type=jnp.float32) + b1e_ref[...]       # (Bp, Hp) f32

    # ----- fused mu || log_var projection: one (Hp, 2*Ep) matmul -----
    mv = jnp.dot(h1.astype(jnp.bfloat16), wmv_ref[...],
                 preferred_element_type=jnp.float32) + bmv_ref[...]       # (Bp, 2*Ep)
    mu = mv[:, :e_pad]                                                    # lane-aligned
    log_var = mv[:, e_pad:]

    # ----- reparameterize: z = eps * exp(0.5 * log_var) + mu  (all f32) -----
    std = jnp.exp(0.5 * log_var)
    z = eps_ref[...] * std + mu                                           # (Bp, Ep)

    # ----- decoder -----
    hd = jnp.dot(z.astype(jnp.bfloat16), w1d_ref[...],
                 preferred_element_type=jnp.float32) + b1d_ref[...]       # (Bp, Hp)
    hd = jnp.maximum(hd, 0.0)                                             # ReLU
    logits = jnp.dot(hd.astype(jnp.bfloat16), w2d_ref[...],
                     preferred_element_type=jnp.float32) + b2d_ref[...]   # (Bp, Dp)
    # sigmoid: exp on EUP, reciprocal on EUP (approx) instead of exact VALU div
    recon_ref[...] = pl.reciprocal(1.0 + jnp.exp(-logits), approx=True)

    mu_ref[...] = mu
    logvar_ref[...] = log_var


# ----------------------------------------------------------------------------
# parameter packing: pad to (8,128) tiles, fuse mu/var weights, cast to bf16.
# Done ONCE outside the per-call path.
# ----------------------------------------------------------------------------
def pack_params(params, encoding_dim):
    E = encoding_dim
    H = 2 * E
    D_in = params["w1e"].shape[0]
    E_pad = _round_up(E, 128)
    H_pad = _round_up(H, 128)
    D_pad = _round_up(D_in, 128)

    def pad2(a, rows, cols):
        return jnp.pad(a, ((0, rows - a.shape[0]), (0, cols - a.shape[1])))

    # encoder fc1
    w1e = pad2(params["w1e"], D_pad, H_pad).astype(jnp.bfloat16)
    b1e = pad2(params["b1e"], 1, H_pad)
    # fused mu || log_var projection: (H_pad, 2*E_pad)
    wmv = jnp.concatenate([pad2(params["wmu"], H_pad, E_pad),
                           pad2(params["wvar"], H_pad, E_pad)],
                          axis=1).astype(jnp.bfloat16)
    bmv = jnp.concatenate([pad2(params["bmu"], 1, E_pad),
                           pad2(params["bvar"], 1, E_pad)], axis=1)
    # decoder
    w1d = pad2(params["w1d"], E_pad, H_pad).astype(jnp.bfloat16)
    b1d = pad2(params["b1d"], 1, H_pad)
    w2d = pad2(params["w2d"], H_pad, D_pad).astype(jnp.bfloat16)
    b2d = pad2(params["b2d"], 1, D_pad)

    return {"w1e": w1e, "b1e": b1e, "wmv": wmv, "bmv": bmv,
            "w1d": w1d, "b1d": b1d, "w2d": w2d, "b2d": b2d}


# ----------------------------------------------------------------------------
# forward wrapper
# ----------------------------------------------------------------------------
@functools.partial(jax.jit, static_argnames=("encoding_dim",))
def vae_forward(x_nchw, packed, eps, *, encoding_dim):
    """x_nchw: (B, 3, H, W) f32; eps: (B, E) f32.  Returns (recon, mu, log_var)."""
    B = x_nchw.shape[0]
    x_flat = x_nchw.reshape(B, -1)                 # == x.view(B, -1)
    D_in = x_flat.shape[1]
    E = encoding_dim

    D_pad = packed["w1e"].shape[0]
    H_pad = packed["w1e"].shape[1]
    E_pad = packed["w1d"].shape[0]
    B_pad = _round_up(max(B, 8), 8)                # full f32 sublane height

    # zero-pad activations: padded lanes/rows stay exactly zero through the
    # whole network (zero weights/biases/eps), sliced off below.
    x_p = jnp.zeros((B_pad, D_pad), jnp.float32).at[:B, :D_in].set(x_flat)
    eps_p = jnp.zeros((B_pad, E_pad), jnp.float32).at[:B, :E].set(eps)

    flops = 2 * B_pad * (D_pad * H_pad + H_pad * 2 * E_pad
                         + E_pad * H_pad + H_pad * D_pad)
    transcendentals = B_pad * (E_pad + D_pad)
    bytes_accessed = (
        x_p.size * 4 + eps_p.size * 4
        + sum(int(v.size) * v.dtype.itemsize for v in packed.values())
        + B_pad * D_pad * 4 + 2 * B_pad * E_pad * 4
    )

    vmem = pl.BlockSpec(memory_space=pltpu.MemorySpace.VMEM)
    kernel = functools.partial(vae_kernel, e_pad=E_pad)

    recon_p, mu_p, lv_p = pl.pallas_call(
        kernel,
        out_shape=(
            jax.ShapeDtypeStruct((B_pad, D_pad), jnp.float32),
            jax.ShapeDtypeStruct((B_pad, E_pad), jnp.float32),
            jax.ShapeDtypeStruct((B_pad, E_pad), jnp.float32),
        ),
        in_specs=[vmem] * 10,
        out_specs=(vmem, vmem, vmem),
        cost_estimate=pl.CostEstimate(
            flops=int(flops),
            transcendentals=int(transcendentals),
            bytes_accessed=int(bytes_accessed)),
    )(x_p,
      packed["w1e"], packed["b1e"],
      packed["wmv"], packed["bmv"],
      eps_p,
      packed["w1d"], packed["b1d"],
      packed["w2d"], packed["b2d"])

    return recon_p[:B, :D_in], mu_p[:B, :E], lv_p[:B, :E]


# ----------------------------------------------------------------------------
# synthetic parameters (torch.nn.Linear-style init), stored (in, out) + (1, out)
# ----------------------------------------------------------------------------
def init_params(key, img_size, encoding_dim):
    D_in = 3 * img_size * img_size
    E = encoding_dim
    ks = jax.random.split(key, 10)

    def lin(k, fan_in, fan_out):
        bound = 1.0 / jnp.sqrt(fan_in)
        return jax.random.uniform(k, (fan_in, fan_out), jnp.float32, -bound, bound)

    def bias(k, fan_in, fan_out):
        bound = 1.0 / jnp.sqrt(fan_in)
        return jax.random.uniform(k, (1, fan_out), jnp.float32, -bound, bound)

    return {
        "w1e": lin(ks[0], D_in, 2 * E), "b1e": bias(ks[1], D_in, 2 * E),
        "wmu": lin(ks[2], 2 * E, E),    "bmu": bias(ks[3], 2 * E, E),
        "wvar": lin(ks[4], 2 * E, E),   "bvar": bias(ks[5], 2 * E, E),
        "w1d": lin(ks[6], E, 2 * E),    "b1d": bias(ks[7], E, 2 * E),
        "w2d": lin(ks[8], 2 * E, D_in), "b2d": bias(ks[9], 2 * E, D_in),
    }


if __name__ == "__main__":
    img_size = 16
    encoding_dim = 32
    batch = 2

    key = jax.random.PRNGKey(0)
    k_param, k_x, k_eps = jax.random.split(key, 3)

    params = init_params(k_param, img_size, encoding_dim)
    packed = pack_params(params, encoding_dim)

    x = jax.random.normal(k_x, (batch, 3, img_size, img_size), jnp.float32)
    # eps ~ N(0, 1): the reparameterization noise, passed in for determinism
    eps = jax.random.normal(k_eps, (batch, encoding_dim), jnp.float32)

    recon, mu, log_var = vae_forward(x, packed, eps, encoding_dim=encoding_dim)
    jax.block_until_ready((recon, mu, log_var))

    # ----- pure-JAX f32 reference (tolerance covers bf16 matmul operands) -----
    x_flat = x.reshape(batch, -1)
    h1 = x_flat @ params["w1e"] + params["b1e"]
    mu_r = h1 @ params["wmu"] + params["bmu"]
    lv_r = h1 @ params["wvar"] + params["bvar"]
    z_r = eps * jnp.exp(0.5 * lv_r) + mu_r
    hd_r = jnp.maximum(z_r @ params["w1d"] + params["b1d"], 0.0)
    recon_r = jax.nn.sigmoid(hd_r @ params["w2d"] + params["b2d"])

    assert recon.shape == (batch, 3 * img_size * img_size)
    assert mu.shape == (batch, encoding_dim)
    assert log_var.shape == (batch, encoding_dim)
    assert jnp.allclose(mu, mu_r, atol=5e-2), float(jnp.max(jnp.abs(mu - mu_r)))
    assert jnp.allclose(log_var, lv_r, atol=5e-2), float(jnp.max(jnp.abs(log_var - lv_r)))
    assert jnp.allclose(recon, recon_r, atol=5e-2), float(jnp.max(jnp.abs(recon - recon_r)))

    print("KERNEL_OK")
</pallas_src>

<mosaic_0001>
module attributes {stable_mosaic.version = 11 : i64} {
  func.func @vae_kernel(%arg0: memref<8x768xf32, #tpu.memory_space<vmem>>, %arg1: memref<768x128xbf16, #tpu.memory_space<vmem>>, %arg2: memref<1x128xf32, #tpu.memory_space<vmem>>, %arg3: memref<128x256xbf16, #tpu.memory_space<vmem>>, %arg4: memref<1x256xf32, #tpu.memory_space<vmem>>, %arg5: memref<8x128xf32, #tpu.memory_space<vmem>>, %arg6: memref<128x128xbf16, #tpu.memory_space<vmem>>, %arg7: memref<1x128xf32, #tpu.memory_space<vmem>>, %arg8: memref<128x768xbf16, #tpu.memory_space<vmem>>, %arg9: memref<1x768xf32, #tpu.memory_space<vmem>>, %arg10: memref<8x768xf32, #tpu.memory_space<vmem>>, %arg11: memref<8x128xf32, #tpu.memory_space<vmem>>, %arg12: memref<8x128xf32, #tpu.memory_space<vmem>>) attributes {dimension_semantics = [], scalar_prefetch = 0 : i64, scratch_operands = 0 : i64, tpu.core_type = #tpu.core_type<tc>} {
    %c0 = arith.constant 0 : index
    %c0_0 = arith.constant 0 : index
    %0 = vector.load %arg0[%c0, %c0_0] : memref<8x768xf32, #tpu.memory_space<vmem>>, vector<8x768xf32>
    %1 = arith.truncf %0 : vector<8x768xf32> to vector<8x768xbf16>
    %c0_1 = arith.constant 0 : index
    %c0_2 = arith.constant 0 : index
    %2 = vector.load %arg1[%c0_1, %c0_2] : memref<768x128xbf16, #tpu.memory_space<vmem>>, vector<768x128xbf16>
    %cst = arith.constant dense<0.000000e+00> : vector<8x128xf32>
    %3 = tpu.matmul %1, %2, %cst {dimension_numbers = #tpu.dot_dimension_numbers<[1], [0], [0], [1], [0, 0, 1, 1], [], []>} : vector<8x768xbf16>, vector<768x128xbf16>, vector<8x128xf32> -> vector<8x128xf32>
    %c0_3 = arith.constant 0 : index
    %c0_4 = arith.constant 0 : index
    %4 = vector.load %arg2[%c0_3, %c0_4] : memref<1x128xf32, #tpu.memory_space<vmem>>, vector<1x128xf32>
    %5 = vector.broadcast %4 : vector<1x128xf32> to vector<8x128xf32>
    %6 = arith.addf %3, %5 : vector<8x128xf32>
    %7 = arith.truncf %6 : vector<8x128xf32> to vector<8x128xbf16>
    %c0_5 = arith.constant 0 : index
    %c0_6 = arith.constant 0 : index
    %8 = vector.load %arg3[%c0_5, %c0_6] : memref<128x256xbf16, #tpu.memory_space<vmem>>, vector<128x256xbf16>
    %cst_7 = arith.constant dense<0.000000e+00> : vector<8x256xf32>
    %9 = tpu.matmul %7, %8, %cst_7 {dimension_numbers = #tpu.dot_dimension_numbers<[1], [0], [0], [1], [0, 0, 1, 1], [], []>} : vector<8x128xbf16>, vector<128x256xbf16>, vector<8x256xf32> -> vector<8x256xf32>
    %c0_8 = arith.constant 0 : index
    %c0_9 = arith.constant 0 : index
    %10 = vector.load %arg4[%c0_8, %c0_9] : memref<1x256xf32, #tpu.memory_space<vmem>>, vector<1x256xf32>
    %11 = vector.broadcast %10 : vector<1x256xf32> to vector<8x256xf32>
    %12 = arith.addf %9, %11 : vector<8x256xf32>
    %13 = vector.extract_strided_slice %12 {offsets = [0, 0], sizes = [8, 128], strides = [1, 1]} : vector<8x256xf32> to vector<8x128xf32>
    %14 = vector.extract_strided_slice %12 {offsets = [0, 128], sizes = [8, 128], strides = [1, 1]} : vector<8x256xf32> to vector<8x128xf32>
    %cst_10 = arith.constant 5.000000e-01 : f32
    %15 = vector.broadcast %cst_10 : f32 to vector<8x128xf32>
    %16 = arith.mulf %15, %14 : vector<8x128xf32>
    %17 = math.exp %16 : vector<8x128xf32>
    %c0_11 = arith.constant 0 : index
    %c0_12 = arith.constant 0 : index
    %18 = vector.load %arg5[%c0_11, %c0_12] : memref<8x128xf32, #tpu.memory_space<vmem>>, vector<8x128xf32>
    %19 = arith.mulf %18, %17 : vector<8x128xf32>
    %20 = arith.addf %19, %13 : vector<8x128xf32>
    %21 = arith.truncf %20 : vector<8x128xf32> to vector<8x128xbf16>
    %c0_13 = arith.constant 0 : index
    %c0_14 = arith.constant 0 : index
    %22 = vector.load %arg6[%c0_13, %c0_14] : memref<128x128xbf16, #tpu.memory_space<vmem>>, vector<128x128xbf16>
    %cst_15 = arith.constant dense<0.000000e+00> : vector<8x128xf32>
    %23 = tpu.matmul %21, %22, %cst_15 {dimension_numbers = #tpu.dot_dimension_numbers<[1], [0], [0], [1], [0, 0, 1, 1], [], []>} : vector<8x128xbf16>, vector<128x128xbf16>, vector<8x128xf32> -> vector<8x128xf32>
    %c0_16 = arith.constant 0 : index
    %c0_17 = arith.constant 0 : index
    %24 = vector.load %arg7[%c0_16, %c0_17] : memref<1x128xf32, #tpu.memory_space<vmem>>, vector<1x128xf32>
    %25 = vector.broadcast %24 : vector<1x128xf32> to vector<8x128xf32>
    %26 = arith.addf %23, %25 : vector<8x128xf32>
    %cst_18 = arith.constant 0.000000e+00 : f32
    %27 = vector.broadcast %cst_18 : f32 to vector<8x128xf32>
    %28 = arith.maximumf %26, %27 : vector<8x128xf32>
    %29 = arith.truncf %28 : vector<8x128xf32> to vector<8x128xbf16>
    %c0_19 = arith.constant 0 : index
    %c0_20 = arith.constant 0 : index
    %30 = vector.load %arg8[%c0_19, %c0_20] : memref<128x768xbf16, #tpu.memory_space<vmem>>, vector<128x768xbf16>
    %cst_21 = arith.constant dense<0.000000e+00> : vector<8x768xf32>
    %31 = tpu.matmul %29, %30, %cst_21 {dimension_numbers = #tpu.dot_dimension_numbers<[1], [0], [0], [1], [0, 0, 1, 1], [], []>} : vector<8x128xbf16>, vector<128x768xbf16>, vector<8x768xf32> -> vector<8x768xf32>
    %c0_22 = arith.constant 0 : index
    %c0_23 = arith.constant 0 : index
    %32 = vector.load %arg9[%c0_22, %c0_23] : memref<1x768xf32, #tpu.memory_space<vmem>>, vector<1x768xf32>
    %33 = vector.broadcast %32 : vector<1x768xf32> to vector<8x768xf32>
    %34 = arith.addf %31, %33 : vector<8x768xf32>
    %cst_24 = arith.constant 0.000000e+00 : f32
    %35 = vector.broadcast %cst_24 : f32 to vector<8x768xf32>
    %36 = arith.subf %35, %34 : vector<8x768xf32>
    %37 = math.exp %36 : vector<8x768xf32>
    %cst_25 = arith.constant 1.000000e+00 : f32
    %38 = vector.broadcast %cst_25 : f32 to vector<8x768xf32>
    %39 = arith.addf %38, %37 : vector<8x768xf32>
    %40 = tpu.reciprocal %39 {approx = true} : vector<8x768xf32> -> vector<8x768xf32>
    %c0_26 = arith.constant 0 : index
    %c0_27 = arith.constant 0 : index
    %41 = vector.load %arg10[%c0_26, %c0_27] : memref<8x768xf32, #tpu.memory_space<vmem>>, vector<8x768xf32>
    tpu.vector_store %arg10[%c0_26, %c0_27], %40 {strides = array<i32>} : memref<8x768xf32, #tpu.memory_space<vmem>>, vector<8x768xf32>,
    %c0_28 = arith.constant 0 : index
    %c0_29 = arith.constant 0 : index
    %42 = vector.load %arg11[%c0_28, %c0_29] : memref<8x128xf32, #tpu.memory_space<vmem>>, vector<8x128xf32>
    tpu.vector_store %arg11[%c0_28, %c0_29], %13 {strides = array<i32>} : memref<8x128xf32, #tpu.memory_space<vmem>>, vector<8x128xf32>,
    %c0_30 = arith.constant 0 : index
    %c0_31 = arith.constant 0 : index
    %43 = vector.load %arg12[%c0_30, %c0_31] : memref<8x128xf32, #tpu.memory_space<vmem>>, vector<8x128xf32>
    tpu.vector_store %arg12[%c0_30, %c0_31], %14 {strides = array<i32>} : memref<8x128xf32, #tpu.memory_space<vmem>>, vector<8x128xf32>,
    return
  }
}

</mosaic_0001>

<bundles_post_ra>
// kernel: vae_forward.1
= control target key start
LH: loop header
LB: loop body
LE: loop exit
PB: predicated region body
PF: predicated region fallthrough
CT: control target
= control target key end

     0   :  { %18 = vsyncpa [#allocation3], 0  ;;  %s2135_s0 = inlined_call_operand.vmem [shape: f32[8,768], index: 0, kind: input, shape index: {}]   ;;  %s2136_s1 = inlined_call_operand.hbm [shape: bf16[768,128], index: 1, kind: input, shape index: {}]   ;;  %s2137_s2 = inlined_call_operand.hbm [shape: f32[1,128], index: 2, kind: input, shape index: {}]   ;;  %s2138_s3 = inlined_call_operand.vmem [shape: bf16[128,256], index: 3, kind: input, shape index: {}]   ;;  %s2139_s4 = inlined_call_operand.vmem [shape: f32[1,256], index: 4, kind: input, shape index: {}]   ;;  %s2140_s5 = inlined_call_operand.vmem [shape: f32[8,128], index: 5, kind: input, shape index: {}]   ;;  %s2141_s6 = inlined_call_operand.vmem [shape: bf16[128,128], index: 6, kind: input, shape index: {}]   ;;  %s2142_s7 = inlined_call_operand.hbm [shape: f32[1,128], index: 7, kind: input, shape index: {}]   ;;  %s2143_s8 = inlined_call_operand.hbm [shape: bf16[128,768], index: 8, kind: input, shape index: {}]   ;;  %s2144_s9 = inlined_call_operand.hbm [shape: f32[1,768], index: 9, kind: input, shape index: {}]   ;;  %s2145_s10 = inlined_call_operand.vmem [shape: f32[8,768], index: 10, kind: output, shape index: {0}]   ;;  %s2146_s11 = inlined_call_operand.vmem [shape: f32[8,128], index: 11, kind: output, shape index: {1}]   ;;  %s2147_s12 = inlined_call_operand.vmem [shape: f32[8,128], index: 12, kind: output, shape index: {2}]  }
   0x1   :  { %19 = vsyncpa [#allocation5], 0 }
   0x2   :  { %20 = vsyncpa [#allocation8], 0  ;;  %s1903_s21 = smov [#allocation4]   ;;  %s1904_s23 = smov [#allocation7]  }
   0x3   :  { %s41_s22 = sshll.u32 %s1903_s21, 4  ;;  %s68_s24 = sshll.u32 %s1904_s23, 4  ;;  %s42_s22 = int_to_ptr.vmem [resolvable:$true] %s41_s22  ;;  %s69_s24 = int_to_ptr.vmem [resolvable:$true] %s68_s24 }
   0x4   :  { %s1805_s25 = scalar_lea.vmem %s42_s22, 16  ;;  %s1809_s26 = scalar_lea.vmem %s42_s22, 32 }
   0x5   :  { %p1806_p0 = scmp.ne.s32.totalorder %s42_s22, %s1805_s25  ;;  %p1810_p1 = scmp.lt.s32.totalorder %s42_s22, %s42_s22 }
   0x6   :  { %p1811_p2 = scmp.lt.s32.totalorder %s1809_s26, %s1805_s25 }
   0x8   :  { %p1812_p3 = por %p1811_p2, %p1810_p1 }
   0xa   :  { %p1813_p4 = pnand %p1812_p3, %p1806_p0 }
   0xc   :  { %1816 = shalt.err (!%p1813_p4)
}
   0xd   :  { %44 = dma.hbm_to_vmem [thread:$0]  %s2137_s2, 16, %s42_s22, [#allocation5]  }
   0xe   :  { %s1825_s29 = scalar_lea.vmem %s69_s24, 6144  ;;  %p1830_p6 = scmp.lt.s32.totalorder %s69_s24, %s69_s24 }
   0xf   :  { %p1826_p5 = scmp.ne.s32.totalorder %s69_s24, %s1825_s29  ;;  %p1831_p7 = scmp.lt.s32.totalorder %s1825_s29, %s1825_s29 }
  0x11   :  { %p1832_p8 = por %p1831_p7, %p1830_p6 }
  0x13   :  { %p1833_p9 = pnand %p1832_p8, %p1826_p5 }
  0x15   :  { %1836 = shalt.err (!%p1833_p9)
}
  0x16   :  { %s1905_s30 = smov 384   ;;  %s1906_s13 = smov 24  }
  0x17   :  { %74 = dma.hbm_to_vmem [thread:$0]  %s2143_s8, 6144, %s69_s24, [#allocation8], %s1905_s30, %s1905_s30, %s1906_s13  }
  0x18   :  { %s1907_s16 = smov [#allocation2]  }
  0x19   :  { %s28_s17 = sshll.u32 %s1907_s16, 4  ;;  %s29_s17 = int_to_ptr.vmem [resolvable:$true] %s28_s17 }
  0x1a   :  { %s1845_s18 = scalar_lea.vmem %s29_s17, 6144  ;;  %p1850_p11 = scmp.lt.s32.totalorder %s29_s17, %s29_s17 }
  0x1b   :  { %p1846_p10 = scmp.ne.s32.totalorder %s29_s17, %s1845_s18  ;;  %p1851_p12 = scmp.lt.s32.totalorder %s1845_s18, %s1845_s18 }
  0x1d   :  { %p1852_p13 = por %p1851_p12, %p1850_p11 }
  0x1f   :  { %p1853_p0 = pnand %p1852_p13, %p1846_p10 }
  0x21   :  { %1856 = shalt.err (!%p1853_p0)
}
  0x22   :  { %s1908_s2 = smov 64   ;;  %s1909_s19 = smov 4  }
  0x23   :  { %34 = dma.hbm_to_vmem [thread:$0]  %s2136_s1, 6144, %s29_s17, [#allocation3], %s1908_s2, %s1908_s2, %s1909_s19  }
  0x24   :  { %s1910_s22 = smov [#allocation6]   ;;  %s1911_s8 = smov [#allocation9]  }
  0x25   :  { %s59_s23 = sshll.u32 %s1910_s22, 4  ;;  %s81_s24 = sshll.u32 %s1911_s8, 4  ;;  %s60_s23 = int_to_ptr.vmem [resolvable:$true] %s59_s23  ;;  %s82_s24 = int_to_ptr.vmem [resolvable:$true] %s81_s24 }
  0x26   :  { %s1865_s25 = scalar_lea.vmem %s60_s23, 16  ;;  %s1869_s26 = scalar_lea.vmem %s60_s23, 32 }
  0x27   :  { %p1866_p1 = scmp.ne.s32.totalorder %s60_s23, %s1865_s25  ;;  %p1870_p2 = scmp.lt.s32.totalorder %s60_s23, %s60_s23 }
  0x28   :  { %p1871_p3 = scmp.lt.s32.totalorder %s1869_s26, %s1865_s25 }
  0x2a   :  { %p1872_p4 = por %p1871_p3, %p1870_p2 }
  0x2c   :  { %p1873_p5 = pnand %p1872_p4, %p1866_p1 }
  0x2e   :  { %1876 = shalt.err (!%p1873_p5)
}
  0x2f   :  { %62 = dma.hbm_to_vmem [thread:$0]  %s2142_s7, 16, %s60_s23, [#allocation5]  }
  0x30   :  { %s1885_s29 = scalar_lea.vmem %s82_s24, 96  ;;  %p1890_p7 = scmp.lt.s32.totalorder %s82_s24, %s82_s24 }
  0x31   :  { %p1886_p6 = scmp.ne.s32.totalorder %s82_s24, %s1885_s29  ;;  %p1891_p8 = scmp.lt.s32.totalorder %s1885_s29, %s1885_s29 }
  0x33   :  { %p1892_p9 = por %p1891_p8, %p1890_p7 }
  0x35   :  { %p1893_p10 = pnand %p1892_p9, %p1886_p6 }
  0x37   :  { %1896 = shalt.err (!%p1893_p10)
}
  0x38   :  { %84 = dma.hbm_to_vmem [thread:$0]  %s2144_s9, 96, %s82_s24, [#allocation8]  }
  0x39   :  { %1897 = dma.done.wait [#allocation3], 6144  }
  0x3a   :  { %1898 = vsyncadd [#allocation3], 4294961152 }
  0x3b   :  { %1899 = dma.done.wait [#allocation5], 32  }
  0x3c   :  { %1900 = vsyncadd [#allocation5], 4294967264 }
  0x3d   :  { %1901 = dma.done.wait [#allocation8], 6240  }
  0x3e   :  { %1902 = vsyncadd [#allocation8], 4294961056  ;;  %v1619_v0 = vld [vmem:[#allocation2 + $0x78] sm:$0xff]   ;;  %v1623_v4 = vld [vmem:[#allocation2 + $0x70] sm:$0xff]   ;;  %vm1914_vm0 = vmmov 0  }
  0x3f   :  { %v1620_v1 = vld [vmem:[#allocation2 + $0x38] sm:$0xff]   ;;  %1512 = vmatprep.subr.bf16.mxu0 %v1619_v0  ;;  %v1624_v5 = vld [vmem:[#allocation2 + $0x30] sm:$0xff]   ;;  %v1627_v8 = vld [vmem:[#allocation2 + $0x68] sm:$0xff]  }
  0x40   :  { %v1621_v2 = vld [vmem:[#allocation2 + $0xf8] sm:$0xff]   ;;  %1513 = vmatpush3.bf16.msra.mxu0 %v1620_v1  ;;  %v1625_v6 = vld [vmem:[#allocation2 + $0xf0] sm:$0xff]   ;;  %v1628_v9 = vld [vmem:[#allocation2 + $0x28] sm:$0xff]  }
  0x41   :  { %v1622_v3 = vld [vmem:[#allocation2 + $0xb8] sm:$0xff]   ;;  %1534 = vmatprep.subr.bf16.mxu1 %v1621_v2  ;;  %1514 = vmatprep.subr.bf16.mxu0 %v1623_v4  ;;  %v1626_v7 = vld [vmem:[#allocation2 + $0xb0] sm:$0xff]   ;;  %v1629_v10 = vld [vmem:[#allocation2 + $0xe8] sm:$0xff]  }
  0x42   :  { %1535 = vmatpush3.bf16.msra.mxu1 %v1622_v3  ;;  %v1630_v11 = vld [vmem:[#allocation2 + $0xa8] sm:$0xff]   ;;  %v1631_v12 = vld [vmem:[#allocation2 + $0x60] sm:$0xff]   ;;  %v1635_v16 = vld [vmem:[#allocation2 + $0x58] sm:$0xff]  }
  0x43   :  { %1536 = vmatprep.subr.bf16.mxu1 %v1625_v6  ;;  %v1632_v13 = vld [vmem:[#allocation2 + $0x20] sm:$0xff]   ;;  %v1636_v17 = vld [vmem:[#allocation2 + $0x18] sm:$0xff]   ;;  %v1639_v20 = vld [vmem:[#allocation2 + $0x50] sm:$0xff]  }
  0x44   :  { %1515 = vmatpush3.bf16.msra.mxu0 %v1624_v5  ;;  %v1633_v14 = vld [vmem:[#allocation2 + $0xe0] sm:$0xff]   ;;  %v1637_v18 = vld [vmem:[#allocation2 + $0xd8] sm:$0xff]   ;;  %v1640_v21 = vld [vmem:[#allocation2 + $0x10] sm:$0xff]  }
  0x45   :  { %1516 = vmatprep.subr.bf16.mxu0 %v1627_v8  ;;  %v1634_v15 = vld [vmem:[#allocation2 + $0xa0] sm:$0xff]   ;;  %v1638_v19 = vld [vmem:[#allocation2 + $0x98] sm:$0xff]   ;;  %v1641_v22 = vld [vmem:[#allocation2 + $0xd0] sm:$0xff]  }
  0x46   :  { %1537 = vmatpush3.bf16.msra.mxu1 %v1626_v7  ;;  %v1642_v23 = vld [vmem:[#allocation2 + $0x90] sm:$0xff]   ;;  %v1643_v24 = vld [vmem:[#allocation2 + $0x48] sm:$0xff]   ;;  %v1647_v28 = vld [vmem:[#allocation2 + $0x40] sm:$0xff]  }
  0x47   :  { %1538 = vmatprep.subr.bf16.mxu1 %v1629_v10  ;;  %v1644_v25 = vld [vmem:[#allocation2 + $0x8] sm:$0xff]   ;;  %v1648_v29 = vld [vmem:[#allocation2] sm:$0xff]   ;;  %v1651_v36 = vld [vmem:[#allocation2 + $0x178] sm:$0xff]  }
  0x48   :  { %1517 = vmatpush3.bf16.msra.mxu0 %v1628_v9  ;;  %v1645_v26 = vld [vmem:[#allocation2 + $0xc8] sm:$0xff]   ;;  %v1649_v30 = vld [vmem:[#allocation2 + $0xc0] sm:$0xff]   ;;  %v104_v37 = vld [vmem:[%s2135_s0 + $0x18] sm:$0xff] }
  0x49   :  { %1518 = vmatprep.subr.bf16.mxu0 %v1631_v12  ;;  %v1646_v27 = vld [vmem:[#allocation2 + $0x88] sm:$0xff]   ;;  %v1650_v33 = vld [vmem:[#allocation2 + $0x80] sm:$0xff]   ;;  %v110_v38 = vpack.c.bf16 %v104_v37, %v104_v37  ;;  %v1652_v39 = vld [vmem:[#allocation2 + $0x138] sm:$0xff]   ;;  %v1912_v12 = vmov 0  }
  0x4a   :  { %1539 = vmatpush3.bf16.msra.mxu1 %v1630_v11  ;;  %v102_v31 = vld [vmem:[%s2135_s0 + $0x8] sm:$0xff]  ;;  %v101_v34 = vld [vmem:[%s2135_s0] sm:$0xff]  ;;  %v103_v40 = vld [vmem:[%s2135_s0 + $0x10] sm:$0xff] }
  0x4b   :  { %1540 = vmatprep.subr.bf16.mxu1 %v1633_v14  ;;  %v108_v32 = vpack.c.bf16 %v102_v31, %v102_v31  ;;  %v107_v35 = vpack.c.bf16 %v101_v34, %v101_v34  ;;  %576 = vmatprep.mubr.bf16.mxu1 %v110_v38  ;;  %v109_v41 = vpack.c.bf16 %v103_v40, %v103_v40  ;;  %v1653_v42 = vld [vmem:[#allocation2 + $0x170] sm:$0xff]   ;;  %v1655_v44 = vld [vmem:[#allocation2 + $0x168] sm:$0xff]   ;;  %v1657_v46 = vld [vmem:[#allocation2 + $0x160] sm:$0xff]   ;;  %v1913_v14 = vmov 0.0  }
  0x4c   :  { %1519 = vmatpush3.bf16.msra.mxu0 %v1632_v13  ;;  %v1654_v43 = vld [vmem:[#allocation2 + $0x130] sm:$0xff]   ;;  %v1656_v45 = vld [vmem:[#allocation2 + $0x128] sm:$0xff]   ;;  %v1658_v47 = vld [vmem:[#allocation2 + $0x120] sm:$0xff]  }
  0x4d   :  { %1520 = vmatprep.subr.bf16.mxu0 %v1635_v16  ;;  %536 = vmatprep.mubr.bf16.mxu0 %v108_v32  ;;  %v1659_v48 = vld [vmem:[#allocation2 + $0x158] sm:$0xff]   ;;  %v1661_v50 = vld [vmem:[#allocation2 + $0x150] sm:$0xff]   ;;  %v106_v51 = vld [vmem:[%s2135_s0 + $0x28] sm:$0xff] }
  0x4e   :  { %1541 = vmatpush3.bf16.msra.mxu1 %v1634_v15  ;;  %v1660_v49 = vld [vmem:[#allocation2 + $0x118] sm:$0xff]   ;;  %v1662_v52 = vld [vmem:[#allocation2 + $0x110] sm:$0xff]   ;;  %v112_v53 = vpack.c.bf16 %v106_v51, %v106_v51  ;;  %v1663_v54 = vld [vmem:[#allocation2 + $0x148] sm:$0xff]  }
  0x4f   :  { %1542 = vmatprep.subr.bf16.mxu1 %v1637_v18  ;;  %v1664_v55 = vld [vmem:[#allocation2 + $0x108] sm:$0xff]   ;;  %v1665_v56 = vld [vmem:[#allocation2 + $0x140] sm:$0xff]   ;;  %v1667_v60 = vld [vmem:[%s2138_s3 + $0x70] ss:$8 sps:$4 sm:$0xff]  }
  0x50   :  { %1521 = vmatpush3.bf16.msra.mxu0 %v1636_v17  ;;  %v1666_v57 = vld [vmem:[#allocation2 + $0x100] sm:$0xff]   ;;  %v1669_v61 = vld [vmem:[%s2138_s3 + $0x74] ss:$8 sps:$4 sm:$0xff]   ;;  %v1673_v1 = vld [vmem:[%s2138_s3 + $0x50] ss:$8 sps:$4 sm:$0xff]  }
  0x51   :  { %1522 = vmatprep.subr.bf16.mxu0 %v1639_v20  ;;  %v105_v58 = vld [vmem:[%s2135_s0 + $0x20] sm:$0xff]  ;;  %v1675_v0 = vld [vmem:[%s2138_s3 + $0x54] ss:$8 sps:$4 sm:$0xff]   ;;  %v1679_v5 = vld [vmem:[%s2138_s3 + $0x30] ss:$8 sps:$4 sm:$0xff]  }
  0x52   :  { %1543 = vmatpush3.bf16.msra.mxu1 %v1638_v19  ;;  %v111_v59 = vpack.c.bf16 %v105_v58, %v105_v58  ;;  %v1672_v62 = vld [vmem:[%s2138_s3 + $0x64] ss:$8 sps:$4 sm:$0xff]   ;;  %v1670_v63 = vld [vmem:[%s2138_s3 + $0x60] ss:$8 sps:$4 sm:$0xff]   ;;  %v1681_v4 = vld [vmem:[%s2138_s3 + $0x34] ss:$8 sps:$4 sm:$0xff]  }
  0x53   :  { %1544 = vmatprep.subr.bf16.mxu1 %v1641_v22  ;;  %v1678_v2 = vld [vmem:[%s2138_s3 + $0x44] ss:$8 sps:$4 sm:$0xff]   ;;  %v1676_v3 = vld [vmem:[%s2138_s3 + $0x40] ss:$8 sps:$4 sm:$0xff]   ;;  %v1685_v8 = vld [vmem:[%s2138_s3 + $0x10] ss:$8 sps:$4 sm:$0xff]  }
  0x54   :  { %1523 = vmatpush3.bf16.msra.mxu0 %v1640_v21  ;;  %v1684_v6 = vld [vmem:[%s2138_s3 + $0x24] ss:$8 sps:$4 sm:$0xff]   ;;  %v1682_v7 = vld [vmem:[%s2138_s3 + $0x20] ss:$8 sps:$4 sm:$0xff]   ;;  %v1687_v9 = vld [vmem:[%s2138_s3 + $0x14] ss:$8 sps:$4 sm:$0xff]  }
  0x55   :  { %1524 = vmatprep.subr.bf16.mxu0 %v1643_v24  ;;  %v1690_v10 = vld [vmem:[%s2138_s3 + $0x4] ss:$8 sps:$4 sm:$0xff]   ;;  %v1688_v11 = vld [vmem:[%s2138_s3] ss:$8 sps:$4 sm:$0xff]   ;;  %v1691_v13 = vld [vmem:[%s2141_s6 + $0x38] sm:$0xff]  }
  0x56   :  { %1545 = vmatpush3.bf16.msra.mxu1 %v1642_v23  ;;  %v1390_v24 = vld [vmem:[#allocation4] ss:$0 sm:$0xff]  ;;  %v1695_v38 = vld [vmem:[%s2141_s6 + $0x18] sm:$0xff]   ;;  %v1697_v40 = vld [vmem:[%s2141_s6 + $0x8] sm:$0xff]  }
  0x57   :  { %1546 = vmatprep.subr.bf16.mxu1 %v1645_v26  ;;  %v1694_v37 = vld [vmem:[%s2141_s6 + $0x20] sm:$0xff]   ;;  %v1725_v51 = vld [vmem:[#allocation7 + $0x94] ss:$24 sps:$4 sm:$0xff]  }
  0x58   :  { %1525 = vmatpush3.bf16.msra.mxu0 %v1644_v25 }
  0x59   :  { %1526 = vmatprep.subr.bf16.mxu0 %v1647_v28 }
  0x5a   :  { %1547 = vmatpush3.bf16.msra.mxu1 %v1646_v27 }
  0x5b   :  { %1548 = vmatprep.subr.bf16.mxu1 %v1649_v30 }
  0x5c   :  { %1527 = vmatpush3.bf16.msra.mxu0 %v1648_v29 }
  0x5d   :  { %1556 = vmatprep.subr.bf16.mxu0 %v1651_v36  ;;  %v1693_v36 = vld [vmem:[%s2141_s6 + $0x28] sm:$0xff]  }
  0x5e   :  { %1549 = vmatpush3.bf16.msra.mxu1 %v1650_v33 }
  0x5f   :  { %537 = vmatmul.mubr.bf16.vlgmr.msra.gmra.mxu0 %v107_v35  ;;  %733 = vmatprep.subr.bf16.mxu1 %v1669_v61  ;;  %v1692_v35 = vld [vmem:[%s2141_s6 + $0x30] sm:$0xff]  }
  0x60   :  { %1557 = vmatpush3.bf16.msra.mxu0 %v1652_v39  ;;  %616 = vmatprep.mubr.bf16.mxu0 %v112_v53  ;;  %v1696_v39 = vld [vmem:[%s2141_s6 + $0x10] sm:$0xff]   ;;  %v1731_v53 = vld [vmem:[#allocation7 + $0x64] ss:$24 sps:$4 sm:$0xff]  }
  0x61   :  { %577 = vmatmul.mubr.bf16.vlgmr.msra.gmra.mxu1 %v109_v41  ;;  %1558 = vmatprep.subr.bf16.mxu0 %v1653_v42  ;;  %v1698_v41 = vld [vmem:[%s2141_s6] sm:$0xff]   ;;  %v1699_v42 = vld [vmem:[#allocation7 + $0x150] ss:$24 sps:$4 sm:$0xff]  }
  0x62   :  { %734 = vmatpush1.bf16.msra.mxu1 %v1667_v60  ;;  %765 = vmatprep.mubr.bf16.mxu1 %v1912_v12  ;;  %v641_v60 = vld [vmem:[%s2139_s4] sm:$0x3] }
  0x63   :  { %735 = vmatprep.subr.bf16.mxu1 %v1672_v62 }
  0x64   :  { %1559 = vmatpush3.bf16.msra.mxu0 %v1654_v43  ;;  %v1701_v43 = vld [vmem:[#allocation7 + $0x154] ss:$24 sps:$4 sm:$0xff]  }
  0x65   :  { %1560 = vmatprep.subr.bf16.mxu0 %v1655_v44  ;;  %v1704_v44 = vld [vmem:[#allocation7 + $0x15c] ss:$24 sps:$4 sm:$0xff]  }
  0x66   :  { %736 = vmatpush1.bf16.msra.mxu1 %v1670_v63 }
  0x67   :  { %737 = vmatprep.subr.bf16.mxu1 %v1675_v0 }
  0x68   :  { %1561 = vmatpush3.bf16.msra.mxu0 %v1656_v45  ;;  %v1707_v45 = vld [vmem:[#allocation7 + $0x124] ss:$24 sps:$4 sm:$0xff]  }
  0x69   :  { %1562 = vmatprep.subr.bf16.mxu0 %v1657_v46  ;;  %v1705_v46 = vld [vmem:[#allocation7 + $0x120] ss:$24 sps:$4 sm:$0xff]  }
  0x6a   :  { %738 = vmatpush1.bf16.msra.mxu1 %v1673_v1 }
  0x6b   :  { %739 = vmatprep.subr.bf16.mxu1 %v1678_v2 }
  0x6c   :  { %1563 = vmatpush3.bf16.msra.mxu0 %v1658_v47  ;;  %v1713_v47 = vld [vmem:[#allocation7 + $0xf4] ss:$24 sps:$4 sm:$0xff]  }
  0x6d   :  { %1564 = vmatprep.subr.bf16.mxu0 %v1659_v48  ;;  %v1711_v48 = vld [vmem:[#allocation7 + $0xf0] ss:$24 sps:$4 sm:$0xff]  }
  0x6e   :  { %740 = vmatpush1.bf16.msra.mxu1 %v1676_v3 }
  0x6f   :  { %741 = vmatprep.subr.bf16.mxu1 %v1681_v4 }
  0x70   :  { %1565 = vmatpush3.bf16.msra.mxu0 %v1660_v49  ;;  %v1719_v49 = vld [vmem:[#allocation7 + $0xc4] ss:$24 sps:$4 sm:$0xff]  }
  0x71   :  { %1566 = vmatprep.subr.bf16.mxu0 %v1661_v50  ;;  %v1717_v50 = vld [vmem:[#allocation7 + $0xc0] ss:$24 sps:$4 sm:$0xff]  }
  0x72   :  { %742 = vmatpush1.bf16.msra.mxu1 %v1679_v5 }
  0x73   :  { %743 = vmatprep.subr.bf16.mxu1 %v1684_v6 }
  0x74   :  { %1567 = vmatpush3.bf16.msra.mxu0 %v1662_v52  ;;  %v1723_v52 = vld [vmem:[#allocation7 + $0x90] ss:$24 sps:$4 sm:$0xff]  }
  0x75   :  { %1568 = vmatprep.subr.bf16.mxu0 %v1663_v54  ;;  %v1729_v54 = vld [vmem:[#allocation7 + $0x60] ss:$24 sps:$4 sm:$0xff]  }
  0x76   :  { %744 = vmatpush1.bf16.msra.mxu1 %v1682_v7 }
  0x77   :  { %745 = vmatprep.subr.bf16.mxu1 %v1687_v9 }
  0x78   :  { %1569 = vmatpush3.bf16.msra.mxu0 %v1664_v55  ;;  %v1737_v55 = vld [vmem:[#allocation7 + $0x34] ss:$24 sps:$4 sm:$0xff]  }
  0x79   :  { %1570 = vmatprep.subr.bf16.mxu0 %v1665_v56  ;;  %v1735_v56 = vld [vmem:[#allocation7 + $0x30] ss:$24 sps:$4 sm:$0xff]  }
  0x7a   :  { %746 = vmatpush1.bf16.msra.mxu1 %v1685_v8  ;;  %v777_v8 = vld [vmem:[%s2140_s5] sm:$0xff] }
  0x7b   :  { %747 = vmatprep.subr.bf16.mxu1 %v1690_v10 }
  0x7c   :  { %1571 = vmatpush3.bf16.msra.mxu0 %v1666_v57  ;;  %v643_v57 = vlaneseq }
  0x7d   :  { %1587 = vmatprep.subr.bf16.mxu0 %v1913_v14 }
  0x7e   :  { %748 = vmatpush1.bf16.msra.mxu1 %v1688_v11  ;;  %v2087_v58 = vshrl.u32 %v643_v57, 7 }
  0x7f   :  { %617 = vmatmul.mubr.bf16.vlgmr.msra.gmra.mxu0 %v111_v59  ;;  %1214 = vmatprep.subr.bf16.mxu1 %v1701_v43  ;;  %v1755_v43 = vld [vmem:[#allocation7 + $0x104] ss:$24 sps:$4 sm:$0xff]  }
  0x80   :  { %1588 = vmatpush3.bf16.msra.mxu0 %v1691_v13  ;;  %1603 = vmatprep.mubr.msk.bf16.mxu0 %vm1914_vm0, %v1913_v14  ;;  %v645_v59 = vsub.s32 0, %v2087_v58  ;;  %v649_v61 = vsub.s32 1, %v2087_v58  ;;  %v1702_v13 = vld [vmem:[#allocation7 + $0x158] ss:$24 sps:$4 sm:$0xff]  }
  0x81   :  { %1589 = vmatprep.subr.bf16.mxu0 %v1913_v14 }
  0x82   :  { %v646_v62 = vrot.slane %v641_v60, %v645_v59  ;;  %v650_v63 = vrot.slane %v641_v60, %v649_v61 }
  0x84   :  { %1590 = vmatpush3.bf16.msra.mxu0 %v1692_v35 }
  0x85   :  { %1591 = vmatprep.subr.bf16.mxu0 %v1913_v14 }
  0x88   :  { %1592 = vmatpush3.bf16.msra.mxu0 %v1693_v36 }
  0x89   :  { %1593 = vmatprep.subr.bf16.mxu0 %v1913_v14 }
  0x8c   :  { %1594 = vmatpush3.bf16.msra.mxu0 %v1694_v37 }
  0x8d   :  { %1595 = vmatprep.subr.bf16.mxu0 %v1913_v14 }
  0x90   :  { %1596 = vmatpush3.bf16.msra.mxu0 %v1695_v38  ;;  %v1747_v38 = vld [vmem:[#allocation7 + $0x160] ss:$24 sps:$4 sm:$0xff]  }
  0x91   :  { %1597 = vmatprep.subr.bf16.mxu0 %v1913_v14 }
  0x94   :  { %1598 = vmatpush3.bf16.msra.mxu0 %v1696_v39 }
  0x95   :  { %1599 = vmatprep.subr.bf16.mxu0 %v1913_v14 }
  0x98   :  { %1600 = vmatpush3.bf16.msra.mxu0 %v1697_v40  ;;  %v1752_v40 = vld [vmem:[#allocation7 + $0x134] ss:$24 sps:$4 sm:$0xff]  }
  0x99   :  { %1601 = vmatprep.subr.bf16.mxu0 %v1913_v14 }
  0x9c   :  { %1602 = vmatpush3.bf16.msra.mxu0 %v1698_v41 }
  0x9d   :  { %1255 = vmatprep.subr.bf16.mxu0 %v1704_v44  ;;  %v1753_v44 = vld [vmem:[#allocation7 + $0x100] ss:$24 sps:$4 sm:$0xff]  }
 0x11f   :  { %v1528_v15 = vpop.f32.mrf.mxu0 }
 0x121   :  { %v1529_v16 = vpop.f32.mrf.mxu0  ;;  %v1550_v17 = vpop.f32.mrf.mxu1 }
 0x122   :  { %v1530_v23 = vadd.f32 %v1529_v16, %v1528_v15  ;;  %v1710_v15 = vld [vmem:[#allocation7 + $0x12c] ss:$24 sps:$4 sm:$0xff]   ;;  %v1708_v16 = vld [vmem:[#allocation7 + $0x128] ss:$24 sps:$4 sm:$0xff]  }
 0x123   :  { %v1531_v18 = vpop.f32.mrf.mxu0  ;;  %v1551_v19 = vpop.f32.mrf.mxu1 }
 0x124   :  { %v539_v25 = vadd.f32 %v1530_v23, %v1390_v24  ;;  %v1552_v26 = vadd.f32 %v1551_v19, %v1550_v17  ;;  %v1716_v17 = vld [vmem:[#allocation7 + $0xfc] ss:$24 sps:$4 sm:$0xff]   ;;  %v1714_v18 = vld [vmem:[#allocation7 + $0xf8] ss:$24 sps:$4 sm:$0xff]   ;;  %v1722_v19 = vld [vmem:[#allocation7 + $0xcc] ss:$24 sps:$4 sm:$0xff]  }
 0x125   :  { %v1532_v20 = vpop.f32.mrf.mxu0  ;;  %v1553_v21 = vpop.f32.mrf.mxu1  ;;  %v1734_v23 = vld [vmem:[#allocation7 + $0x6c] ss:$24 sps:$4 sm:$0xff]   ;;  %v1732_v24 = vld [vmem:[#allocation7 + $0x68] ss:$24 sps:$4 sm:$0xff]  }
 0x126   :  { %v579_v29 = vadd.f32 %v1552_v26, %v539_v25  ;;  %v1720_v20 = vld [vmem:[#allocation7 + $0xc8] ss:$24 sps:$4 sm:$0xff]   ;;  %v1728_v21 = vld [vmem:[#allocation7 + $0x9c] ss:$24 sps:$4 sm:$0xff]   ;;  %v1738_v26 = vld [vmem:[#allocation7 + $0x38] ss:$24 sps:$4 sm:$0xff]  }
 0x127   :  { %v1554_v22 = vpop.f32.mrf.mxu1  ;;  %v1740_v25 = vld [vmem:[#allocation7 + $0x3c] ss:$24 sps:$4 sm:$0xff]  }
 0x128   :  { %v1726_v22 = vld [vmem:[#allocation7 + $0x98] ss:$24 sps:$4 sm:$0xff]  }
 0x13f   :  { %v1572_v27 = vpop.f32.mrf.mxu0 }
 0x141   :  { %v1573_v28 = vpop.f32.mrf.mxu0 }
 0x142   :  { %v1574_v30 = vadd.f32 %v1573_v28, %v1572_v27  ;;  %v1743_v27 = vld [vmem:[#allocation7 + $0x4] ss:$24 sps:$4 sm:$0xff]   ;;  %v1741_v28 = vld [vmem:[#allocation7] ss:$24 sps:$4 sm:$0xff]  }
 0x143   :  { %v1575_v31 = vpop.f32.mrf.mxu0 }
 0x144   :  { %v619_v32 = vadd.f32 %v1574_v30, %v579_v29  ;;  %v1746_v29 = vld [vmem:[#allocation7 + $0xc] ss:$24 sps:$4 sm:$0xff]   ;;  %v1744_v30 = vld [vmem:[#allocation7 + $0x8] ss:$24 sps:$4 sm:$0xff]  }
 0x145   :  { %v1576_v33 = vpop.f32.mrf.mxu0  ;;  %v1749_v31 = vld [vmem:[#allocation7 + $0x164] ss:$24 sps:$4 sm:$0xff]  }
 0x146   :  { %v624_v34 = vpack.c.bf16 %v619_v32, %v619_v32  ;;  %v1455_v32 = vld [vmem:[#allocation6] ss:$0 sm:$0xff] }
 0x148   :  { %766 = vmatmul.mubr.bf16.vlgmr.msra.gmra.mxu1 %v624_v34 }
 0x149   :  { %1246 = vmatprep.mubr.bf16.mxu1 %v1912_v12  ;;  %1215 = vmatpush1.bf16.msra.mxu1 %v1699_v42  ;;  %v1750_v42 = vld [vmem:[#allocation7 + $0x130] ss:$24 sps:$4 sm:$0xff]  }
 0x14a   :  { %1216 = vmatprep.subr.bf16.mxu1 %v1707_v45  ;;  %v1758_v45 = vld [vmem:[#allocation7 + $0xd4] ss:$24 sps:$4 sm:$0xff]  }
 0x14d   :  { %1217 = vmatpush1.bf16.msra.mxu1 %v1705_v46  ;;  %v1756_v46 = vld [vmem:[#allocation7 + $0xd0] ss:$24 sps:$4 sm:$0xff]  }
 0x14e   :  { %1218 = vmatprep.subr.bf16.mxu1 %v1713_v47  ;;  %v1761_v47 = vld [vmem:[#allocation7 + $0xa4] ss:$24 sps:$4 sm:$0xff]  }
 0x151   :  { %1219 = vmatpush1.bf16.msra.mxu1 %v1711_v48  ;;  %v1759_v48 = vld [vmem:[#allocation7 + $0xa0] ss:$24 sps:$4 sm:$0xff]  }
 0x152   :  { %1220 = vmatprep.subr.bf16.mxu1 %v1719_v49  ;;  %v1764_v49 = vld [vmem:[#allocation7 + $0x74] ss:$24 sps:$4 sm:$0xff]  }
 0x155   :  { %1221 = vmatpush1.bf16.msra.mxu1 %v1717_v50  ;;  %v1762_v50 = vld [vmem:[#allocation7 + $0x70] ss:$24 sps:$4 sm:$0xff]  }
 0x156   :  { %1222 = vmatprep.subr.bf16.mxu1 %v1725_v51  ;;  %v1767_v51 = vld [vmem:[#allocation7 + $0x44] ss:$24 sps:$4 sm:$0xff]  }
 0x159   :  { %1223 = vmatpush1.bf16.msra.mxu1 %v1723_v52  ;;  %v1770_v52 = vld [vmem:[#allocation7 + $0x14] ss:$24 sps:$4 sm:$0xff]  }
 0x15a   :  { %1224 = vmatprep.subr.bf16.mxu1 %v1731_v53  ;;  %v1768_v53 = vld [vmem:[#allocation7 + $0x10] ss:$24 sps:$4 sm:$0xff]  }
 0x15d   :  { %1225 = vmatpush1.bf16.msra.mxu1 %v1729_v54  ;;  %v954_v54 = vsub.s32 2, %v2087_v58 }
 0x15e   :  { %1226 = vmatprep.subr.bf16.mxu1 %v1737_v55  ;;  %v942_v55 = vld [vmem:[#allocation9] sm:$0x3f] }
 0x15f   :  { %v947_v57 = vrot.slane %v942_v55, %v645_v59  ;;  %v955_v60 = vrot.slane %v942_v55, %v954_v54 }
 0x161   :  { %1227 = vmatpush1.bf16.msra.mxu1 %v1735_v56  ;;  %v958_v56 = vsub.s32 3, %v2087_v58 }
 0x162   :  { %1228 = vmatprep.subr.bf16.mxu1 %v1743_v27  ;;  %v962_v27 = vsub.s32 4, %v2087_v58 }
 0x165   :  { %1229 = vmatpush1.bf16.msra.mxu1 %v1741_v28  ;;  %v966_v28 = vsub.s32 5, %v2087_v58 }
 0x166   :  { %1296 = vmatprep.subr.bf16.mxu1 %v1749_v31 }
 0x208   :  { %v767_v0 = vpop.f32.mrf.mxu1 }
 0x209   :  { %v768_v1 = vadd.f32 %v767_v0, %v646_v62  ;;  %v951_v62 = vrot.slane %v942_v55, %v649_v61 }
 0x20a   :  { %v769_v2 = vpop.f32.mrf.mxu1 }
 0x20b   :  { %1373 = vst [vmem:[%s2146_s11] sm:$0xff] %v768_v1  ;;  %v770_v3 = vadd.f32 %v769_v2, %v650_v63  ;;  %v959_v63 = vrot.slane %v942_v55, %v958_v56 }
 0x20c   :  { %v771_v4 = vpop.f32.mrf.mxu1 }
 0x20d   :  { %v774_v5 = vmul.f32 0.5, %v770_v3  ;;  %1374 = vst [vmem:[%s2147_s12] sm:$0xff] %v770_v3 }
 0x20e   :  { %v772_v6 = vpop.f32.mrf.mxu1 }
 0x20f   :  { %v775_v7 = vmul.f32 1.442695, %v774_v5 }
 0x211   :  { %1771 = vpow2.f32 %v775_v7 }
 0x21e   :  { %v1772_v9 = vpop.eup %1771 }
 0x21f   :  { %v778_v10 = vmul.f32 %v1772_v9, %v777_v8 }
 0x221   :  { %v779_v11 = vadd.f32 %v778_v10, %v768_v1 }
 0x223   :  { %v780_v14 = vpack.c.bf16 %v779_v11, %v779_v11 }
 0x225   :  { %1604 = vmatmul.mubr.bf16.vlgmr.msra.gmra.mxu0 %v780_v14 }
 0x226   :  { %1256 = vmatpush1.bf16.msra.mxu0 %v1702_v13  ;;  %1287 = vmatprep.mubr.bf16.mxu0 %v1912_v12 }
 0x227   :  { %1257 = vmatprep.subr.bf16.mxu0 %v1710_v15 }
 0x22a   :  { %1258 = vmatpush1.bf16.msra.mxu0 %v1708_v16 }
 0x22b   :  { %1259 = vmatprep.subr.bf16.mxu0 %v1716_v17 }
 0x22e   :  { %1260 = vmatpush1.bf16.msra.mxu0 %v1714_v18 }
 0x22f   :  { %1261 = vmatprep.subr.bf16.mxu0 %v1722_v19 }
 0x232   :  { %1262 = vmatpush1.bf16.msra.mxu0 %v1720_v20 }
 0x233   :  { %1263 = vmatprep.subr.bf16.mxu0 %v1728_v21 }
 0x236   :  { %1264 = vmatpush1.bf16.msra.mxu0 %v1726_v22 }
 0x237   :  { %1265 = vmatprep.subr.bf16.mxu0 %v1734_v23 }
 0x23a   :  { %1266 = vmatpush1.bf16.msra.mxu0 %v1732_v24 }
 0x23b   :  { %1267 = vmatprep.subr.bf16.mxu0 %v1740_v25 }
 0x23e   :  { %1268 = vmatpush1.bf16.msra.mxu0 %v1738_v26 }
 0x23f   :  { %1269 = vmatprep.subr.bf16.mxu0 %v1746_v29  ;;  %v963_v29 = vrot.slane %v942_v55, %v962_v27 }
 0x242   :  { %1270 = vmatpush1.bf16.msra.mxu0 %v1744_v30  ;;  %v967_v30 = vrot.slane %v942_v55, %v966_v28 }
 0x2e5   :  { %v886_v33 = vpop.f32.mrf.mxu0 }
 0x2e6   :  { %v887_v34 = vadd.f32 %v1455_v32, %v886_v33 }
 0x2e7   :  { %v1605_v35 = vpop.f32.mrf.mxu0 }
 0x2e8   :  { %v892_v36 = vmax.f32 %v887_v34, 0.0 }
 0x2e9   :  { %v889_v37 = vpop.f32.mrf.mxu0 }
 0x2ea   :  { %v893_v39 = vpack.c.bf16 %v892_v36, %v892_v36 }
 0x2eb   :  { %v1606_v41 = vpop.f32.mrf.mxu0 }
 0x2ec   :  { %1247 = vmatmul.mubr.bf16.vlgmr.msra.gmra.mxu1 %v893_v39  ;;  %1288 = vmatmul.mubr.bf16.vlgmr.msra.gmra.mxu0 %v893_v39 }
 0x2ed   :  { %1297 = vmatpush1.bf16.msra.mxu1 %v1747_v38  ;;  %1328 = vmatprep.mubr.bf16.mxu1 %v1912_v12  ;;  %v1765_v12 = vld [vmem:[#allocation7 + $0x40] ss:$24 sps:$4 sm:$0xff]  }
 0x2ee   :  { %1298 = vmatprep.subr.bf16.mxu1 %v1752_v40 }
 0x2f1   :  { %1299 = vmatpush1.bf16.msra.mxu1 %v1750_v42 }
 0x2f2   :  { %1300 = vmatprep.subr.bf16.mxu1 %v1755_v43 }
 0x2f5   :  { %1301 = vmatpush1.bf16.msra.mxu1 %v1753_v44 }
 0x2f6   :  { %1302 = vmatprep.subr.bf16.mxu1 %v1758_v45 }
 0x2f9   :  { %1303 = vmatpush1.bf16.msra.mxu1 %v1756_v46 }
 0x2fa   :  { %1304 = vmatprep.subr.bf16.mxu1 %v1761_v47 }
 0x2fd   :  { %1305 = vmatpush1.bf16.msra.mxu1 %v1759_v48 }
 0x2fe   :  { %1306 = vmatprep.subr.bf16.mxu1 %v1764_v49 }
 0x301   :  { %1307 = vmatpush1.bf16.msra.mxu1 %v1762_v50 }
 0x302   :  { %1308 = vmatprep.subr.bf16.mxu1 %v1767_v51 }
 0x305   :  { %1309 = vmatpush1.bf16.msra.mxu1 %v1765_v12 }
 0x306   :  { %1310 = vmatprep.subr.bf16.mxu1 %v1770_v52 }
 0x309   :  { %1311 = vmatpush1.bf16.msra.mxu1 %v1768_v53 }
 0x30c   :  { %1329 = vmatmul.mubr.bf16.vlgmr.msra.gmra.mxu1 %v893_v39 }
 0x3ac   :  { %v1248_v0 = vpop.f32.mrf.mxu1  ;;  %v1289_v1 = vpop.f32.mrf.mxu0 }
 0x3ad   :  { %v1249_v2 = vadd.f32 %v1248_v0, %v947_v57  ;;  %v1290_v3 = vadd.f32 %v1289_v1, %v955_v60 }
 0x3ae   :  { %v1250_v4 = vpop.f32.mrf.mxu1  ;;  %v1291_v5 = vpop.f32.mrf.mxu0 }
 0x3af   :  { %v1337_v6 = vsub.f32 0.0, %v1249_v2  ;;  %v1339_v7 = vsub.f32 0.0, %v1290_v3  ;;  %v1251_v8 = vadd.f32 %v1250_v4, %v951_v62  ;;  %v1292_v9 = vadd.f32 %v1291_v5, %v959_v63 }
 0x3b0   :  { %v1252_v10 = vpop.f32.mrf.mxu1  ;;  %v1293_v11 = vpop.f32.mrf.mxu0 }
 0x3b1   :  { %v1343_v13 = vmul.f32 1.442695, %v1337_v6  ;;  %v1347_v14 = vmul.f32 1.442695, %v1339_v7  ;;  %v1338_v59 = vsub.f32 0.0, %v1251_v8  ;;  %v1340_v15 = vsub.f32 0.0, %v1292_v9 }
 0x3b2   :  { %v1253_v16 = vpop.f32.mrf.mxu1  ;;  %v1294_v17 = vpop.f32.mrf.mxu0 }
 0x3b3   :  { %1773 = vpow2.f32 %v1343_v13  ;;  %v1345_v61 = vmul.f32 1.442695, %v1338_v59  ;;  %v1349_v18 = vmul.f32 1.442695, %v1340_v15 }
 0x3b4   :  { %1775 = vpow2.f32 %v1347_v14 }
 0x3b5   :  { %1777 = vpow2.f32 %v1345_v61 }
 0x3b6   :  { %1779 = vpow2.f32 %v1349_v18 }
 0x3c0   :  { %v1774_v19 = vpop.eup %1773 }
 0x3c1   :  { %v1776_v20 = vpop.eup %1775  ;;  %v1355_v21 = vadd.f32 1.0, %v1774_v19 }
 0x3c2   :  { %v1778_v22 = vpop.eup %1777  ;;  %v1357_v23 = vadd.f32 1.0, %v1776_v20 }
 0x3c3   :  { %v1780_v24 = vpop.eup %1779  ;;  %1781 = vrcp.f32 %v1355_v21  ;;  %v1356_v25 = vadd.f32 1.0, %v1778_v22 }
 0x3c4   :  { %1783 = vrcp.f32 %v1357_v23  ;;  %v1358_v26 = vadd.f32 1.0, %v1780_v24 }
 0x3c5   :  { %1785 = vrcp.f32 %v1356_v25 }
 0x3c6   :  { %1787 = vrcp.f32 %v1358_v26 }
 0x3cc   :  { %v1330_v31 = vpop.f32.mrf.mxu1 }
 0x3cd   :  { %v1331_v32 = vadd.f32 %v1330_v31, %v963_v29 }
 0x3ce   :  { %v1332_v33 = vpop.f32.mrf.mxu1 }
 0x3cf   :  { %v1341_v34 = vsub.f32 0.0, %v1331_v32  ;;  %v1333_v35 = vadd.f32 %v1332_v33, %v967_v30 }
 0x3d0   :  { %v1782_v36 = vpop.eup %1781  ;;  %v1334_v37 = vpop.f32.mrf.mxu1 }
 0x3d1   :  { %v1784_v38 = vpop.eup %1783  ;;  %1367 = vst [vmem:[%s2145_s10] sm:$0xff] %v1782_v36  ;;  %v1351_v39 = vmul.f32 1.442695, %v1341_v34  ;;  %v1342_v40 = vsub.f32 0.0, %v1333_v35 }
 0x3d2   :  { %v1786_v41 = vpop.eup %1785  ;;  %1369 = vst [vmem:[%s2145_s10 + $0x10] sm:$0xff] %v1784_v38  ;;  %v1335_v58 = vpop.f32.mrf.mxu1 }
 0x3d3   :  { %v1788_v42 = vpop.eup %1787  ;;  %1368 = vst [vmem:[%s2145_s10 + $0x8] sm:$0xff] %v1786_v41  ;;  %1789 = vpow2.f32 %v1351_v39  ;;  %v1353_v43 = vmul.f32 1.442695, %v1342_v40 }
 0x3d4   :  { %1370 = vst [vmem:[%s2145_s10 + $0x18] sm:$0xff] %v1788_v42 }
 0x3d5   :  { %1791 = vpow2.f32 %v1353_v43 }
 0x3e0   :  { %v1790_v44 = vpop.eup %1789 }
 0x3e1   :  { %v1359_v45 = vadd.f32 1.0, %v1790_v44 }
 0x3e2   :  { %v1792_v46 = vpop.eup %1791 }
 0x3e3   :  { %1793 = vrcp.f32 %v1359_v45  ;;  %v1360_v47 = vadd.f32 1.0, %v1792_v46 }
 0x3e5   :  { %1795 = vrcp.f32 %v1360_v47 }
 0x3f0   :  { %v1794_v48 = vpop.eup %1793 }
 0x3f1   :  { %1371 = vst [vmem:[%s2145_s10 + $0x20] sm:$0xff] %v1794_v48 }
 0x3f2   :  { %v1796_v49 = vpop.eup %1795 }
 0x3f3   :  { %1372 = vst [vmem:[%s2145_s10 + $0x28] sm:$0xff] %v1796_v49 }
 0x3f4   :  { %1387 = vsyncpa [#allocation3], 1 }
 0x3f5   :  { %1388 = vsyncpa [#allocation5], 1 }
 0x3f6   :  { %1389 = vsyncpa [#allocation8], 1 }

</bundles_post_ra>
